<compile_context>
chip_gen: v7x
topology: tpu7x:2x2x1
jax: 0.10.0
libtpu: 0.0.40
codegen_flags: <defaults>
</compile_context>

<pallas_src>
import functools

import jax
import jax.numpy as jnp
from jax import lax
from jax.experimental import pallas as pl
from jax.experimental.pallas import tpu as pltpu

EPS = 1e-5


def _adain_kernel(content_ref, style_ref, out_ref, *, hw_true):
    # content_ref: (TR, HW_pad)   style_ref: (TR, 2)   out_ref: (TR, HW_pad)
    x = content_ref[...].astype(jnp.float32)
    tr, hw_pad = x.shape

    inv_n = jnp.float32(1.0 / hw_true)
    inv_nm1 = jnp.float32(1.0 / max(hw_true - 1, 1)) if hw_true > 1 else jnp.float32(jnp.inf)

    if hw_pad == hw_true:
        # No spatial padding: straightforward reduction.
        mean = jnp.sum(x, axis=-1, keepdims=True) * inv_n
        diff = x - mean
        var = jnp.sum(diff * diff, axis=-1, keepdims=True) * inv_nm1
    else:
        # Spatial axis was zero-padded to a multiple of 128 in the wrapper.
        # Pad columns contribute 0 to sum(x); mask them out of the variance.
        col = lax.broadcasted_iota(jnp.int32, (tr, hw_pad), 1)
        valid = (col < hw_true).astype(jnp.float32)
        mean = jnp.sum(x, axis=-1, keepdims=True) * inv_n
        diff = x - mean
        var = jnp.sum(diff * diff * valid, axis=-1, keepdims=True) * inv_nm1

    # Per-row rsqrt on the EUP; fold the style std into a single per-row scale.
    inv_std = lax.rsqrt(var + jnp.float32(EPS))          # (TR, 1)
    s_mean = style_ref[:, 0:1].astype(jnp.float32)       # (TR, 1)
    s_std = style_ref[:, 1:2].astype(jnp.float32)        # (TR, 1)
    scale = s_std * inv_std                              # (TR, 1)

    out_ref[...] = (diff * scale + s_mean).astype(out_ref.dtype)


def adain_set(content, style_mean, style_std):
    """content: [N, C, H, W]; style_mean/style_std: [N, C] (or reshapeable to
    [N, C]). Returns [N, C, H, W]."""
    N, C, H, W = content.shape
    NC, HW = N * C, H * W
    dtype = content.dtype
    itemsize = jnp.dtype(dtype).itemsize

    # ---- shapes / padding -------------------------------------------------
    # Lane-dense spatial axis: pad H*W up to a multiple of 128.
    HW_pad = ((HW + 127) // 128) * 128

    # Row tile: largest multiple of 8 whose per-buffer footprint stays under
    # ~4 MiB (portable cap: leaves room for double-buffered in + out on v5e's
    # 16 MiB default scope and v7x's 64 MiB physical VMEM).
    TILE_CAP_BYTES = 4 * 1024 * 1024
    max_rows = max(8, (TILE_CAP_BYTES // max(HW_pad * itemsize, 1)) // 8 * 8)

    nc8 = ((NC + 7) // 8) * 8
    TR = min(max_rows, nc8)
    # Prefer at least 2 grid steps when enough rows exist (v7x: 2 TensorCores
    # share the "parallel" axis; a 1-step grid idles one of them).
    if TR >= nc8 and nc8 >= 16:
        TR = ((nc8 // 2 + 7) // 8) * 8

    NC_pad = ((nc8 + TR - 1) // TR) * TR
    grid = (NC_pad // TR,)

    # ---- operand prep -----------------------------------------------------
    content2d = content.reshape(NC, HW)
    style2d = jnp.concatenate(
        [jnp.reshape(style_mean, (NC, 1)), jnp.reshape(style_std, (NC, 1))],
        axis=-1,
    ).astype(jnp.float32)

    pad_rows = NC_pad - NC
    pad_cols = HW_pad - HW
    if pad_rows or pad_cols:
        content2d = jnp.pad(content2d, ((0, pad_rows), (0, pad_cols)))
    if pad_rows:
        style2d = jnp.pad(style2d, ((0, pad_rows), (0, 0)))

    # ---- VMEM budget ------------------------------------------------------
    # double-buffered input + output tiles + tiny style tiles + headroom
    tile_bytes = TR * HW_pad * itemsize
    vmem_limit = int(min(48 * 1024 * 1024, max(32 * 1024 * 1024, 6 * tile_bytes)))

    kernel = functools.partial(_adain_kernel, hw_true=HW)

    out2d = pl.pallas_call(
        kernel,
        out_shape=jax.ShapeDtypeStruct((NC_pad, HW_pad), dtype),
        grid_spec=pl.GridSpec(
            grid=grid,
            in_specs=[
                pl.BlockSpec((TR, HW_pad), lambda i: (i, 0)),
                pl.BlockSpec((TR, 2), lambda i: (i, 0)),
            ],
            out_specs=pl.BlockSpec((TR, HW_pad), lambda i: (i, 0)),
        ),
        compiler_params=pltpu.CompilerParams(
            dimension_semantics=("parallel",),
            vmem_limit_bytes=vmem_limit,
        ),
    )(content2d, style2d)

    if pad_rows or pad_cols:
        out2d = out2d[:NC, :HW]
    return out2d.reshape(N, C, H, W)


def _adain_ref(content, style_mean, style_std):
    N, C, H, W = content.shape
    x = content.reshape(N, C, -1).astype(jnp.float32)
    mean = jnp.mean(x, axis=2).reshape(N, C, 1, 1)
    var = jnp.var(x, axis=2, ddof=1).reshape(N, C, 1, 1) + EPS
    std = jnp.sqrt(var)
    sm = style_mean.reshape(N, C, 1, 1).astype(jnp.float32)
    ss = style_std.reshape(N, C, 1, 1).astype(jnp.float32)
    normalized = (content.astype(jnp.float32) - mean) / std
    return (normalized * ss + sm).astype(content.dtype)


if __name__ == "__main__":
    key = jax.random.PRNGKey(0)
    k1, k2, k3 = jax.random.split(key, 3)

    N, C, H, W = 2, 4, 16, 16
    content = jax.random.normal(k1, (N, C, H, W), dtype=jnp.float32)
    style_mean = jax.random.normal(k2, (N, C), dtype=jnp.float32)
    style_std = jax.random.uniform(k3, (N, C), dtype=jnp.float32,
                                   minval=0.5, maxval=1.5)

    out = adain_set(content, style_mean, style_std)
    out = jax.block_until_ready(out)

    ref = _adain_ref(content, style_mean, style_std)
    assert out.shape == (N, C, H, W)
    assert jnp.allclose(out, ref, atol=1e-4, rtol=1e-4), (
        float(jnp.max(jnp.abs(out - ref))))

    print("KERNEL_OK")
</pallas_src>

<mosaic_0001>
module attributes {stable_mosaic.version = 11 : i64} {
  func.func @_adain_kernel(%arg0: i32, %arg1: memref<8x256xf32, #tpu.memory_space<vmem>>, %arg2: memref<8x2xf32, #tpu.memory_space<vmem>>, %arg3: memref<8x256xf32, #tpu.memory_space<vmem>>) attributes {dimension_semantics = [#tpu.dimension_semantics<parallel>], iteration_bounds = array<i64: 1>, scalar_prefetch = 0 : i64, scratch_operands = 0 : i64, tpu.core_type = #tpu.core_type<tc>, window_params = [{transform_indices = @transform_0, window_bounds = array<i64: 8, 256>}, {transform_indices = @transform_1, window_bounds = array<i64: 8, 2>}, {transform_indices = @transform_2, window_bounds = array<i64: 8, 256>}]} {
    %c0 = arith.constant 0 : index
    %c0_0 = arith.constant 0 : index
    %0 = vector.load %arg1[%c0, %c0_0] : memref<8x256xf32, #tpu.memory_space<vmem>>, vector<8x256xf32>
    %cst = arith.constant dense<0.000000e+00> : vector<8xf32>
    %1 = vector.multi_reduction <add>, %0, %cst [1] : vector<8x256xf32> to vector<8xf32>
    %2 = vector.shape_cast %1 : vector<8xf32> to vector<8x1xf32>
    %cst_1 = arith.constant 3.906250e-03 : f32
    %3 = vector.broadcast %cst_1 : f32 to vector<8x1xf32>
    %4 = arith.mulf %2, %3 : vector<8x1xf32>
    %5 = vector.broadcast %4 : vector<8x1xf32> to vector<8x256xf32>
    %6 = arith.subf %0, %5 : vector<8x256xf32>
    %7 = arith.mulf %6, %6 : vector<8x256xf32>
    %cst_2 = arith.constant dense<0.000000e+00> : vector<8xf32>
    %8 = vector.multi_reduction <add>, %7, %cst_2 [1] : vector<8x256xf32> to vector<8xf32>
    %9 = vector.shape_cast %8 : vector<8xf32> to vector<8x1xf32>
    %cst_3 = arith.constant 0.00392156886 : f32
    %10 = vector.broadcast %cst_3 : f32 to vector<8x1xf32>
    %11 = arith.mulf %9, %10 : vector<8x1xf32>
    %cst_4 = arith.constant 9.99999974E-6 : f32
    %12 = vector.broadcast %cst_4 : f32 to vector<8x1xf32>
    %13 = arith.addf %11, %12 : vector<8x1xf32>
    %14 = math.rsqrt %13 : vector<8x1xf32>
    %c0_5 = arith.constant 0 : index
    %c0_6 = arith.constant 0 : index
    %15 = vector.load %arg2[%c0_5, %c0_6] : memref<8x2xf32, #tpu.memory_space<vmem>>, vector<8x1xf32>
    %c0_7 = arith.constant 0 : index
    %c1 = arith.constant 1 : index
    %16 = vector.load %arg2[%c0_7, %c1] : memref<8x2xf32, #tpu.memory_space<vmem>>, vector<8x1xf32>
    %17 = arith.mulf %16, %14 : vector<8x1xf32>
    %18 = vector.broadcast %17 : vector<8x1xf32> to vector<8x256xf32>
    %19 = arith.mulf %6, %18 : vector<8x256xf32>
    %20 = vector.broadcast %15 : vector<8x1xf32> to vector<8x256xf32>
    %21 = arith.addf %19, %20 : vector<8x256xf32>
    %c0_8 = arith.constant 0 : index
    %c0_9 = arith.constant 0 : index
    %22 = vector.load %arg3[%c0_8, %c0_9] : memref<8x256xf32, #tpu.memory_space<vmem>>, vector<8x256xf32>
    tpu.vector_store %arg3[%c0_8, %c0_9], %21 {strides = array<i32>} : memref<8x256xf32, #tpu.memory_space<vmem>>, vector<8x256xf32>,
    return
  }
  func.func @transform_0(%arg0: i32) -> (i32, i32) {
    %c0_i32 = arith.constant 0 : i32
    %c0_i32_0 = arith.constant 0 : i32
    return %arg0, %c0_i32 : i32, i32
  }
  func.func @transform_1(%arg0: i32) -> (i32, i32) {
    %c0_i32 = arith.constant 0 : i32
    %c0_i32_0 = arith.constant 0 : i32
    return %arg0, %c0_i32 : i32, i32
  }
  func.func @transform_2(%arg0: i32) -> (i32, i32) {
    %c0_i32 = arith.constant 0 : i32
    %c0_i32_0 = arith.constant 0 : i32
    return %arg0, %c0_i32 : i32, i32
  }
}

</mosaic_0001>

<bundles_post_ra>
// kernel: tpu_custom_call.1
= control target key start
LH: loop header
LB: loop body
LE: loop exit
PB: predicated region body
PF: predicated region fallthrough
CT: control target
= control target key end

     0   :  { %7 = vsyncpa [#allocation3], 0  ;;  %s176_s0 = inlined_call_operand.hbm [shape: f32[8,256], index: 0, kind: input, shape index: {}]   ;;  %s177_s1 = inlined_call_operand.vmem [shape: f32[8,2], index: 1, kind: input, shape index: {}]   ;;  %s178_s2 = inlined_call_operand.hbm [shape: f32[8,256], index: 2, kind: output, shape index: {}]  }
   0x1   :  { %8 = vsyncpa [#allocation4], 0  ;;  %s130_s9 = smov [#allocation2]   ;;  %s82_s13 = scalar_lea.hbm %s176_s0, 256 }
   0x2   :  { %s15_s10 = sshll.u32 %s130_s9, 4  ;;  %p83_p0 = scmp.ne.s32.totalorder %s176_s0, %s82_s13  ;;  %s16_s10 = int_to_ptr.vmem [resolvable:$true] %s15_s10 }
   0x3   :  { %p86_p1 = scmp.lt.u32.totalorder %s82_s13, %s176_s0 }
   0x5   :  { %p88_p2 = pnand %p86_p1, %p83_p0 }
   0x7   :  { %91 = shalt.err (!%p88_p2)
}
   0x8   :  { %s92_s18 = scalar_lea.vmem %s16_s10, 256  ;;  %p97_p4 = scmp.lt.s32.totalorder %s16_s10, %s16_s10 }
   0x9   :  { %p93_p3 = scmp.ne.s32.totalorder %s16_s10, %s92_s18  ;;  %p98_p5 = scmp.lt.s32.totalorder %s92_s18, %s92_s18 }
   0xb   :  { %p99_p6 = por %p98_p5, %p97_p4 }
   0xd   :  { %p100_p7 = pnand %p99_p6, %p93_p3 }
   0xf   :  { %103 = shalt.err (!%p100_p7)
}
  0x10   :  { %18 = dma.hbm_to_vmem [thread:$0]  %s176_s0, 256, %s16_s10, [#allocation3]  }
  0x11   :  { %126 = dma.done.wait [#allocation3], 256  }
  0x12   :  { %127 = vsyncadd [#allocation3], 4294967040  ;;  %v24_v0 = vld [vmem:[#allocation2] sm:$0xff]  ;;  %v25_v1 = vld [vmem:[#allocation2 + $0x8] sm:$0xff]  ;;  %v131_v10 = vmov 1   ;;  %v132_v11 = vmov 0  }
  0x13   :  { %v26_v2 = vadd.f32 %v25_v1, %v24_v0  ;;  %77 = vset.pattern.permute.xlu1 %v131_v10  ;;  %79 = vset.pattern.permute.xlu0 %v132_v11  ;;  %v40_v15 = vld [vmem:[%s177_s1] sm:$0xff]  ;;  %s133_s22 = smov [#allocation5]  }
  0x14   :  { %s64_s23 = sshll.u32 %s133_s22, 4  ;;  %s65_s23 = int_to_ptr.vmem [resolvable:$true] %s64_s23 }
  0x15   :  { %27 = vadd.xlane.f32.xlu0 %v26_v2  ;;  %s104_s24 = scalar_lea.vmem %s65_s23, 256  ;;  %p109_p9 = scmp.lt.s32.totalorder %s65_s23, %s65_s23 }
  0x16   :  { %p105_p8 = scmp.ne.s32.totalorder %s65_s23, %s104_s24  ;;  %p110_p10 = scmp.lt.s32.totalorder %s104_s24, %s104_s24 }
  0x18   :  { %p111_p11 = por %p110_p10, %p109_p9 }
  0x1a   :  { %p112_p12 = pnand %p111_p11, %p105_p8 }
  0xa2   :  { %v28_v3 = vpop.xlane.xlu0 %27 }
  0xa3   :  { %v29_v4 = vmul.f32 0.00390625, %v28_v3 }
  0xa5   :  { %v30_v5 = vsub.f32 %v24_v0, %v29_v4  ;;  %v31_v6 = vsub.f32 %v25_v1, %v29_v4 }
  0xa7   :  { %v32_v7 = vmul.f32 %v30_v5, %v30_v5  ;;  %v33_v8 = vmul.f32 %v31_v6, %v31_v6 }
  0xa9   :  { %v34_v9 = vadd.f32 %v33_v8, %v32_v7 }
  0xab   :  { %35 = vadd.xlane.f32.xlu0 %v34_v9 }
 0x138   :  { %v36_v12 = vpop.xlane.xlu0 %35 }
 0x139   :  { %v37_v13 = vmul.f32 0.003921569, %v36_v12 }
 0x13b   :  { %v38_v14 = vadd.f32 1e-05, %v37_v13 }
 0x13d   :  { %80 = vrsqrt.f32 %v38_v14 }
 0x147   :  { %v81_v16 = vpop.eup %80 }
 0x148   :  { %v41_v17 = vmul.f32 %v81_v16, %v40_v15 }
 0x14a   :  { %44 = vperm.xlu1 %77, %v41_v17  }
 0x14e   :  { %78 = vset.pattern.permute.xlu1 %v132_v11 }
 0x14f   :  { %51 = vperm.xlu1 %78, %v40_v15  }
 0x1c9   :  { %v45_v18 = vpop.permute.xlu1 %44 }
 0x1ca   :  { %v47_v19 = vmul.f32 %v45_v18, %v30_v5  ;;  %v48_v20 = vmul.f32 %v45_v18, %v31_v6 }
 0x1ce   :  { %v52_v21 = vpop.permute.xlu1 %51 }
 0x1cf   :  { %v54_v22 = vadd.f32 %v52_v21, %v47_v19  ;;  %v55_v23 = vadd.f32 %v52_v21, %v48_v20 }
 0x1d1   :  { %56 = vst [vmem:[#allocation5] sm:$0xff] %v54_v22  ;;  %57 = vst [vmem:[#allocation5 + $0x8] sm:$0xff] %v55_v23 }
 0x1d2   :  { %115 = shalt.err (!%p112_p12)
}
 0x1d3   :  { %s116_s26 = scalar_lea.hbm %s178_s2, 256 }
 0x1d4   :  { %p117_p13 = scmp.ne.s32.totalorder %s178_s2, %s116_s26  ;;  %p120_p0 = scmp.lt.u32.totalorder %s116_s26, %s178_s2 }
 0x1d6   :  { %p122_p1 = pnand %p120_p0, %p117_p13 }
 0x1d8   :  { %125 = shalt.err (!%p122_p1)
}
 0x1d9   :  { %67 = dma.vmem_to_hbm [thread:$0]  %s65_s23, 256, %s178_s2, [#allocation4]  }
 0x1da   :  { %128 = dma.done.wait [#allocation4], 256  }
 0x1db   :  { %129 = vsyncadd [#allocation4], 4294967040 }
 0x1dc   :  { %71 = vsyncpa [#allocation3], 1 }
 0x1dd   :  { %72 = vsyncpa [#allocation4], 1 }

</bundles_post_ra>
